<compile_context>
chip_gen: v7x
topology: tpu7x:2x2x1
jax: 0.10.0
libtpu: 0.0.40
codegen_flags: <defaults>
</compile_context>

<pallas_src>
import jax
import jax.numpy as jnp
from jax import lax
from jax.experimental import pallas as pl
from jax.experimental.pallas import tpu as pltpu

HIDDEN = 16


def _make_kernel(sub_rows, n_sub, unroll, compute_dtype):
    """Fused 4-layer MLP over one (tile_rows, L) batch tile.

    The tile is processed in `n_sub` sub-chunks of `sub_rows` rows so live
    activations stay within a handful of vregs (no spill traffic) while the
    BlockSpec DMA tile stays large for HBM bandwidth.
    """

    def kernel(x_ref,
               w1_ref, b1_ref,
               w2_ref, b2_ref,
               w3_ref, b3_ref,
               w4_ref, b4_ref,
               o_ref):
        def body(c, carry):
            r = pl.multiple_of(c * sub_rows, sub_rows)
            x = x_ref[pl.ds(r, sub_rows), :]

            h = jnp.dot(x.astype(compute_dtype), w1_ref[...],
                        preferred_element_type=jnp.float32) + b1_ref[...]
            h = jnp.maximum(h, 0.0)                                   # ReLU

            h = jnp.dot(h.astype(compute_dtype), w2_ref[...],
                        preferred_element_type=jnp.float32) + b2_ref[...]
            h = jnp.maximum(h, 0.0)                                   # ReLU

            h = jnp.dot(h.astype(compute_dtype), w3_ref[...],
                        preferred_element_type=jnp.float32) + b3_ref[...]
            h = jnp.maximum(h, 0.0)                                   # ReLU

            y = jnp.dot(h.astype(compute_dtype), w4_ref[...],
                        preferred_element_type=jnp.float32) + b4_ref[...]
            o_ref[pl.ds(r, sub_rows), :] = jax.nn.sigmoid(y).astype(o_ref.dtype)
            return carry

        lax.fori_loop(0, n_sub, body, 0, unroll=unroll)

    return kernel


def _dp_and_fold(dim):
    """Padded feature width Dp and lane-fold factor so fold*Dp % 128 == 0."""
    if dim >= 128:
        dp = -(-dim // 128) * 128           # next multiple of 128
        return dp, 1
    dp = 1 << max(0, (dim - 1).bit_length())  # next pow2 <= 128 (divides 128)
    return dp, 128 // dp


def _default_use_bf16():
    # bf16 MXU inputs are strongly preferred on v5-class chips (f32 matmul is
    # multi-pass there); on v6e/v7x keep f32 for tighter parity by default.
    try:
        kind = jax.devices()[0].device_kind.lower()
    except Exception:
        return False
    return ("v5" in kind) or ("v4" in kind)


def autoencoder_forward(x, params, *, tile_rows=None, use_bf16_matmul=None):
    """x: (B, Dim) float32.  params: dict of PyTorch-convention (out, in) weights."""
    B, Dim = x.shape
    x = x.astype(jnp.float32)

    if use_bf16_matmul is None:
        use_bf16_matmul = _default_use_bf16()
    compute_dtype = jnp.bfloat16 if use_bf16_matmul else jnp.float32

    # ---- lane-dense layout: pad Dim -> Dp, fold rows so last dim % 128 == 0 --
    Dp, fold = _dp_and_fold(Dim)
    L = fold * Dp                                     # HBM-facing lane width
    feat_pad = Dp - Dim

    # ---- parameter glue -------------------------------------------------------
    # PyTorch (out,in) -> (in,out); zero-pad the Dim-facing axes to Dp; fold via
    # block-diagonal kron(I_fold, W) + fold-tiled biases (mathematically equal
    # to the unfolded Linear layers on each folded row group).
    f32 = jnp.float32

    def t(w):
        return w.astype(f32).T

    w1t = jnp.pad(t(params["w1"]), ((0, feat_pad), (0, 0)))        # (Dp, 16)
    w2t = t(params["w2"])                                          # (16, 16)
    w3t = t(params["w3"])                                          # (16, 16)
    w4t = jnp.pad(t(params["w4"]), ((0, 0), (0, feat_pad)))        # (16, Dp)
    b1v = params["b1"].astype(f32)
    b2v = params["b2"].astype(f32)
    b3v = params["b3"].astype(f32)
    b4v = jnp.pad(params["b4"].astype(f32), (0, feat_pad))

    eye = jnp.eye(fold, dtype=f32)

    def fold_w(wt):
        return jnp.kron(eye, wt)

    def fold_b(b):
        return jnp.tile(b.reshape(1, -1), (1, fold))

    w1 = fold_w(w1t).astype(compute_dtype); b1 = fold_b(b1v)
    w2 = fold_w(w2t).astype(compute_dtype); b2 = fold_b(b2v)
    w3 = fold_w(w3t).astype(compute_dtype); b3 = fold_b(b3v)
    w4 = fold_w(w4t).astype(compute_dtype); b4 = fold_b(b4v)

    # ---- batch-tile selection (rows of the *folded* layout) ------------------
    rows_needed = -(-B // fold)
    if tile_rows is None:
        # ~8 MiB x tile (amortizes ~0.35 us/step grid overhead; measured copy
        # scaling reaches ~85%+ of HBM roofline at multi-MiB tiles), but prefer
        # >= ~4 grid steps when there is enough work so the 'parallel' axis
        # keeps both v7x TensorCores fed.
        budget = max(8, (((8 << 20) // (L * 4)) // 8) * 8)
        quarter = max(8, ((-(-rows_needed // 4)) + 7) // 8 * 8)
        tile_rows = min(budget, quarter)
    assert tile_rows % 8 == 0, "tile_rows must be a multiple of 8 (sublanes)"
    grid = -(-rows_needed // tile_rows)
    rows = grid * tile_rows                           # padded folded row count
    b_pad = rows * fold

    # inner sub-chunk size / unroll policy (never fall back to a fully rolled
    # loop: visible loops cost ~35% because chains can't interleave).
    sub_rows = 8
    for cand in (128, 64, 32, 16, 8):
        if tile_rows % cand == 0:
            sub_rows = cand
            break
    n_sub = tile_rows // sub_rows
    unroll = n_sub if n_sub <= 8 else 4

    # ---- VMEM budget (x + out double buffers + weight blocks) ----------------
    tile_bytes = tile_rows * L * 4
    weight_bytes = sum(int(a.size) * a.dtype.itemsize
                       for a in (w1, b1, w2, b2, w3, b3, w4, b4))
    vmem_limit = 4 * tile_bytes + 2 * weight_bytes + (4 << 20)
    vmem_limit = int(min(48 << 20, max(16 << 20, vmem_limit)))   # <= 48 MiB (v7x safe)

    # ---- pad batch/features + fold rows into lanes (row-major reshape = free) -
    if b_pad != B or feat_pad:
        x = jnp.pad(x, ((0, b_pad - B), (0, feat_pad)))
    x_f = x.reshape(rows, L)

    def full_spec(a):
        # Small, constant-index blocks: Pallas skips the re-DMA when the block
        # index does not change between consecutive grid steps.
        return pl.BlockSpec(a.shape, lambda i: (0,) * a.ndim)

    grid_spec = pltpu.PrefetchScalarGridSpec(
        num_scalar_prefetch=0,
        grid=(grid,),
        in_specs=[
            pl.BlockSpec((tile_rows, L), lambda i: (i, 0)),
            full_spec(w1), full_spec(b1),
            full_spec(w2), full_spec(b2),
            full_spec(w3), full_spec(b3),
            full_spec(w4), full_spec(b4),
        ],
        out_specs=pl.BlockSpec((tile_rows, L), lambda i: (i, 0)),
    )

    out_f = pl.pallas_call(
        _make_kernel(sub_rows, n_sub, unroll, compute_dtype),
        out_shape=jax.ShapeDtypeStruct((rows, L), jnp.float32),
        grid_spec=grid_spec,
        compiler_params=pltpu.CompilerParams(
            dimension_semantics=("parallel",),        # megacore-shardable axis
            vmem_limit_bytes=vmem_limit,
        ),
    )(x_f, w1, b1, w2, b2, w3, b3, w4, b4)

    return out_f.reshape(b_pad, Dp)[:B, :Dim]


def init_params(key, dim):
    """Deterministic init mimicking nn.Linear's U(-1/sqrt(fan_in), +1/sqrt(fan_in))."""
    def linear(k, out_f, in_f):
        kw, kb = jax.random.split(k)
        bound = 1.0 / jnp.sqrt(jnp.float32(in_f))
        w = jax.random.uniform(kw, (out_f, in_f), jnp.float32, -bound, bound)
        b = jax.random.uniform(kb, (out_f,), jnp.float32, -bound, bound)
        return w, b

    k1, k2, k3, k4 = jax.random.split(key, 4)
    w1, b1 = linear(k1, HIDDEN, dim)     # encoder.0: Linear(Dim, 16)
    w2, b2 = linear(k2, HIDDEN, HIDDEN)  # encoder.2: Linear(16, 16)
    w3, b3 = linear(k3, HIDDEN, HIDDEN)  # decoder.0: Linear(16, 16)
    w4, b4 = linear(k4, dim, HIDDEN)     # decoder.2: Linear(16, Dim)
    return dict(w1=w1, b1=b1, w2=w2, b2=b2, w3=w3, b3=b3, w4=w4, b4=b4)


def reference_forward(x, p):
    h = jnp.maximum(x @ p["w1"].T + p["b1"], 0.0)
    h = jnp.maximum(h @ p["w2"].T + p["b2"], 0.0)
    h = jnp.maximum(h @ p["w3"].T + p["b3"], 0.0)
    return jax.nn.sigmoid(h @ p["w4"].T + p["b4"])


if __name__ == "__main__":
    key = jax.random.PRNGKey(0)
    k1, k2, k3, k4, k5, k6 = jax.random.split(key, 6)

    # Case 1: Dim divides 128 (fold=4), tiny batch -- f32 and bf16 MXU paths.
    B, Dim = 8, 32
    x = jax.random.normal(k1, (B, Dim), jnp.float32)
    params = init_params(k2, Dim)
    ref = reference_forward(x, params)

    out = jax.block_until_ready(
        autoencoder_forward(x, params, use_bf16_matmul=False))
    assert out.shape == (B, Dim)
    assert jnp.max(jnp.abs(out - ref)) < 5e-5

    out_bf16 = jax.block_until_ready(
        autoencoder_forward(x, params, use_bf16_matmul=True))
    assert out_bf16.shape == (B, Dim)
    assert jnp.max(jnp.abs(out_bf16 - ref)) < 5e-2

    # Case 2: Dim does NOT divide 128 (24 -> padded to 32, fold=4), batch not a
    # multiple of fold*tile_rows -> multi-step grid + batch & feature padding.
    B2, Dim2 = 200, 24
    x2 = jax.random.normal(k3, (B2, Dim2), jnp.float32)
    params2 = init_params(k4, Dim2)
    ref2 = reference_forward(x2, params2)
    out2 = jax.block_until_ready(
        autoencoder_forward(x2, params2, use_bf16_matmul=False))
    assert out2.shape == (B2, Dim2)
    assert jnp.max(jnp.abs(out2 - ref2)) < 5e-5
    # default (device-dependent) matmul dtype path, default tile selection
    out2d = jax.block_until_ready(autoencoder_forward(x2, params2))
    assert out2d.shape == (B2, Dim2)
    assert jnp.max(jnp.abs(out2d - ref2)) < 5e-2

    # Case 3: Dim > 128, not a multiple of 128 (136 -> padded to 256, fold=1).
    B3, Dim3 = 16, 136
    x3 = jax.random.normal(k5, (B3, Dim3), jnp.float32)
    params3 = init_params(k6, Dim3)
    ref3 = reference_forward(x3, params3)
    out3 = jax.block_until_ready(
        autoencoder_forward(x3, params3, use_bf16_matmul=False))
    assert out3.shape == (B3, Dim3)
    assert jnp.max(jnp.abs(out3 - ref3)) < 5e-5

    print("KERNEL_OK")
</pallas_src>

<mosaic_0001>
module attributes {stable_mosaic.version = 11 : i64} {
  func.func @kernel(%arg0: i32, %arg1: memref<8x128xf32, #tpu.memory_space<vmem>>, %arg2: memref<128x64xf32, #tpu.memory_space<vmem>>, %arg3: memref<1x64xf32, #tpu.memory_space<vmem>>, %arg4: memref<64x64xf32, #tpu.memory_space<vmem>>, %arg5: memref<1x64xf32, #tpu.memory_space<vmem>>, %arg6: memref<64x64xf32, #tpu.memory_space<vmem>>, %arg7: memref<1x64xf32, #tpu.memory_space<vmem>>, %arg8: memref<64x128xf32, #tpu.memory_space<vmem>>, %arg9: memref<1x128xf32, #tpu.memory_space<vmem>>, %arg10: memref<8x128xf32, #tpu.memory_space<vmem>>) attributes {dimension_semantics = [#tpu.dimension_semantics<parallel>], iteration_bounds = array<i64: 1>, scalar_prefetch = 0 : i64, scratch_operands = 0 : i64, tpu.core_type = #tpu.core_type<tc>, window_params = [{transform_indices = @transform_0, window_bounds = array<i64: 8, 128>}, {pipeline_mode = #tpu.pipeline_mode<synchronous>, transform_indices = @transform_1, window_bounds = array<i64: 128, 64>}, {pipeline_mode = #tpu.pipeline_mode<synchronous>, transform_indices = @transform_2, window_bounds = array<i64: 1, 64>}, {pipeline_mode = #tpu.pipeline_mode<synchronous>, transform_indices = @transform_3, window_bounds = array<i64: 64, 64>}, {pipeline_mode = #tpu.pipeline_mode<synchronous>, transform_indices = @transform_4, window_bounds = array<i64: 1, 64>}, {pipeline_mode = #tpu.pipeline_mode<synchronous>, transform_indices = @transform_5, window_bounds = array<i64: 64, 64>}, {pipeline_mode = #tpu.pipeline_mode<synchronous>, transform_indices = @transform_6, window_bounds = array<i64: 1, 64>}, {pipeline_mode = #tpu.pipeline_mode<synchronous>, transform_indices = @transform_7, window_bounds = array<i64: 64, 128>}, {pipeline_mode = #tpu.pipeline_mode<synchronous>, transform_indices = @transform_8, window_bounds = array<i64: 1, 128>}, {transform_indices = @transform_9, window_bounds = array<i64: 8, 128>}]} {
    %c0_i32 = arith.constant 0 : i32
    %c8_i32 = arith.constant 8 : i32
    %0 = arith.muli %c0_i32, %c8_i32 : i32
    %1 = tpu.assume_multiple %0, 8 : i32
    %2 = arith.index_cast %1 : i32 to index
    %c0 = arith.constant 0 : index
    %3 = vector.load %arg1[%2, %c0] : memref<8x128xf32, #tpu.memory_space<vmem>>, vector<8x128xf32>
    %c0_0 = arith.constant 0 : index
    %c0_1 = arith.constant 0 : index
    %4 = vector.load %arg2[%c0_0, %c0_1] : memref<128x64xf32, #tpu.memory_space<vmem>>, vector<128x64xf32>
    %cst = arith.constant dense<0.000000e+00> : vector<8x64xf32>
    %5 = tpu.matmul %3, %4, %cst {dimension_numbers = #tpu.dot_dimension_numbers<[1], [0], [0], [1], [0, 0, 1, 1], [], []>} : vector<8x128xf32>, vector<128x64xf32>, vector<8x64xf32> -> vector<8x64xf32>
    %c0_2 = arith.constant 0 : index
    %c0_3 = arith.constant 0 : index
    %6 = vector.load %arg3[%c0_2, %c0_3] : memref<1x64xf32, #tpu.memory_space<vmem>>, vector<1x64xf32>
    %7 = vector.broadcast %6 : vector<1x64xf32> to vector<8x64xf32>
    %8 = arith.addf %5, %7 : vector<8x64xf32>
    %cst_4 = arith.constant 0.000000e+00 : f32
    %9 = vector.broadcast %cst_4 : f32 to vector<8x64xf32>
    %10 = arith.maximumf %8, %9 : vector<8x64xf32>
    %c0_5 = arith.constant 0 : index
    %c0_6 = arith.constant 0 : index
    %11 = vector.load %arg4[%c0_5, %c0_6] : memref<64x64xf32, #tpu.memory_space<vmem>>, vector<64x64xf32>
    %cst_7 = arith.constant dense<0.000000e+00> : vector<8x64xf32>
    %12 = tpu.matmul %10, %11, %cst_7 {dimension_numbers = #tpu.dot_dimension_numbers<[1], [0], [0], [1], [0, 0, 1, 1], [], []>} : vector<8x64xf32>, vector<64x64xf32>, vector<8x64xf32> -> vector<8x64xf32>
    %c0_8 = arith.constant 0 : index
    %c0_9 = arith.constant 0 : index
    %13 = vector.load %arg5[%c0_8, %c0_9] : memref<1x64xf32, #tpu.memory_space<vmem>>, vector<1x64xf32>
    %14 = vector.broadcast %13 : vector<1x64xf32> to vector<8x64xf32>
    %15 = arith.addf %12, %14 : vector<8x64xf32>
    %cst_10 = arith.constant 0.000000e+00 : f32
    %16 = vector.broadcast %cst_10 : f32 to vector<8x64xf32>
    %17 = arith.maximumf %15, %16 : vector<8x64xf32>
    %c0_11 = arith.constant 0 : index
    %c0_12 = arith.constant 0 : index
    %18 = vector.load %arg6[%c0_11, %c0_12] : memref<64x64xf32, #tpu.memory_space<vmem>>, vector<64x64xf32>
    %cst_13 = arith.constant dense<0.000000e+00> : vector<8x64xf32>
    %19 = tpu.matmul %17, %18, %cst_13 {dimension_numbers = #tpu.dot_dimension_numbers<[1], [0], [0], [1], [0, 0, 1, 1], [], []>} : vector<8x64xf32>, vector<64x64xf32>, vector<8x64xf32> -> vector<8x64xf32>
    %c0_14 = arith.constant 0 : index
    %c0_15 = arith.constant 0 : index
    %20 = vector.load %arg7[%c0_14, %c0_15] : memref<1x64xf32, #tpu.memory_space<vmem>>, vector<1x64xf32>
    %21 = vector.broadcast %20 : vector<1x64xf32> to vector<8x64xf32>
    %22 = arith.addf %19, %21 : vector<8x64xf32>
    %cst_16 = arith.constant 0.000000e+00 : f32
    %23 = vector.broadcast %cst_16 : f32 to vector<8x64xf32>
    %24 = arith.maximumf %22, %23 : vector<8x64xf32>
    %c0_17 = arith.constant 0 : index
    %c0_18 = arith.constant 0 : index
    %25 = vector.load %arg8[%c0_17, %c0_18] : memref<64x128xf32, #tpu.memory_space<vmem>>, vector<64x128xf32>
    %cst_19 = arith.constant dense<0.000000e+00> : vector<8x128xf32>
    %26 = tpu.matmul %24, %25, %cst_19 {dimension_numbers = #tpu.dot_dimension_numbers<[1], [0], [0], [1], [0, 0, 1, 1], [], []>} : vector<8x64xf32>, vector<64x128xf32>, vector<8x128xf32> -> vector<8x128xf32>
    %c0_20 = arith.constant 0 : index
    %c0_21 = arith.constant 0 : index
    %27 = vector.load %arg9[%c0_20, %c0_21] : memref<1x128xf32, #tpu.memory_space<vmem>>, vector<1x128xf32>
    %28 = vector.broadcast %27 : vector<1x128xf32> to vector<8x128xf32>
    %29 = arith.addf %26, %28 : vector<8x128xf32>
    %30 = arith.negf %29 : vector<8x128xf32>
    %31 = math.exp %30 : vector<8x128xf32>
    %cst_22 = arith.constant 1.000000e+00 : f32
    %32 = vector.broadcast %cst_22 : f32 to vector<8x128xf32>
    %33 = arith.addf %32, %31 : vector<8x128xf32>
    %34 = arith.divf %32, %33 : vector<8x128xf32>
    %35 = arith.index_cast %1 : i32 to index
    %c0_23 = arith.constant 0 : index
    %36 = vector.load %arg10[%35, %c0_23] : memref<8x128xf32, #tpu.memory_space<vmem>>, vector<8x128xf32>
    tpu.vector_store %arg10[%35, %c0_23], %34 {strides = array<i32>} : memref<8x128xf32, #tpu.memory_space<vmem>>, vector<8x128xf32>,
    %c1_i32 = arith.constant 1 : i32
    return
  }
  func.func @transform_0(%arg0: i32) -> (i32, i32) {
    %c0_i32 = arith.constant 0 : i32
    %c0_i32_0 = arith.constant 0 : i32
    return %arg0, %c0_i32 : i32, i32
  }
  func.func @transform_1(%arg0: i32) -> (i32, i32) {
    %c0_i32 = arith.constant 0 : i32
    %c0_i32_0 = arith.constant 0 : i32
    %c0_i32_1 = arith.constant 0 : i32
    return %c0_i32, %c0_i32_0 : i32, i32
  }
  func.func @transform_2(%arg0: i32) -> (i32, i32) {
    %c0_i32 = arith.constant 0 : i32
    %c0_i32_0 = arith.constant 0 : i32
    %c0_i32_1 = arith.constant 0 : i32
    return %c0_i32, %c0_i32_0 : i32, i32
  }
  func.func @transform_3(%arg0: i32) -> (i32, i32) {
    %c0_i32 = arith.constant 0 : i32
    %c0_i32_0 = arith.constant 0 : i32
    %c0_i32_1 = arith.constant 0 : i32
    return %c0_i32, %c0_i32_0 : i32, i32
  }
  func.func @transform_4(%arg0: i32) -> (i32, i32) {
    %c0_i32 = arith.constant 0 : i32
    %c0_i32_0 = arith.constant 0 : i32
    %c0_i32_1 = arith.constant 0 : i32
    return %c0_i32, %c0_i32_0 : i32, i32
  }
  func.func @transform_5(%arg0: i32) -> (i32, i32) {
    %c0_i32 = arith.constant 0 : i32
    %c0_i32_0 = arith.constant 0 : i32
    %c0_i32_1 = arith.constant 0 : i32
    return %c0_i32, %c0_i32_0 : i32, i32
  }
  func.func @transform_6(%arg0: i32) -> (i32, i32) {
    %c0_i32 = arith.constant 0 : i32
    %c0_i32_0 = arith.constant 0 : i32
    %c0_i32_1 = arith.constant 0 : i32
    return %c0_i32, %c0_i32_0 : i32, i32
  }
  func.func @transform_7(%arg0: i32) -> (i32, i32) {
    %c0_i32 = arith.constant 0 : i32
    %c0_i32_0 = arith.constant 0 : i32
    %c0_i32_1 = arith.constant 0 : i32
    return %c0_i32, %c0_i32_0 : i32, i32
  }
  func.func @transform_8(%arg0: i32) -> (i32, i32) {
    %c0_i32 = arith.constant 0 : i32
    %c0_i32_0 = arith.constant 0 : i32
    %c0_i32_1 = arith.constant 0 : i32
    return %c0_i32, %c0_i32_0 : i32, i32
  }
  func.func @transform_9(%arg0: i32) -> (i32, i32) {
    %c0_i32 = arith.constant 0 : i32
    %c0_i32_0 = arith.constant 0 : i32
    return %arg0, %c0_i32 : i32, i32
  }
}

</mosaic_0001>

<bundles_post_ra>
// kernel: tpu_custom_call.1
= control target key start
LH: loop header
LB: loop body
LE: loop exit
PB: predicated region body
PF: predicated region fallthrough
CT: control target
= control target key end

     0   :  { %14 = vsyncpa [#allocation3], 0  ;;  %s932_s0 = inlined_call_operand.hbm [shape: f32[8,128], index: 0, kind: input, shape index: {}]   ;;  %s933_s1 = inlined_call_operand.vmem [shape: f32[128,64], index: 1, kind: input, shape index: {}]   ;;  %s934_s2 = inlined_call_operand.vmem [shape: f32[1,64], index: 2, kind: input, shape index: {}]   ;;  %s935_s3 = inlined_call_operand.vmem [shape: f32[64,64], index: 3, kind: input, shape index: {}]   ;;  %s936_s4 = inlined_call_operand.vmem [shape: f32[1,64], index: 4, kind: input, shape index: {}]   ;;  %s937_s5 = inlined_call_operand.vmem [shape: f32[64,64], index: 5, kind: input, shape index: {}]   ;;  %s938_s6 = inlined_call_operand.vmem [shape: f32[1,64], index: 6, kind: input, shape index: {}]   ;;  %s939_s7 = inlined_call_operand.vmem [shape: f32[64,128], index: 7, kind: input, shape index: {}]   ;;  %s940_s8 = inlined_call_operand.vmem [shape: f32[1,128], index: 8, kind: input, shape index: {}]   ;;  %s941_s9 = inlined_call_operand.hbm [shape: f32[8,128], index: 9, kind: output, shape index: {}]  }
   0x1   :  { %15 = vsyncpa [#allocation4], 0  ;;  %s690_s30 = smov [#allocation2]   ;;  %s642_s13 = scalar_lea.hbm %s932_s0, 128 }
   0x2   :  { %s22_s10 = sshll.u32 %s690_s30, 4  ;;  %p643_p0 = scmp.ne.s32.totalorder %s932_s0, %s642_s13  ;;  %s23_s10 = int_to_ptr.vmem [resolvable:$true] %s22_s10 }
   0x3   :  { %p646_p1 = scmp.lt.u32.totalorder %s642_s13, %s932_s0 }
   0x5   :  { %p648_p2 = pnand %p646_p1, %p643_p0 }
   0x7   :  { %651 = shalt.err (!%p648_p2)
}
   0x8   :  { %s652_s18 = scalar_lea.vmem %s23_s10, 128  ;;  %p657_p4 = scmp.lt.s32.totalorder %s23_s10, %s23_s10 }
   0x9   :  { %p653_p3 = scmp.ne.s32.totalorder %s23_s10, %s652_s18  ;;  %p658_p5 = scmp.lt.s32.totalorder %s652_s18, %s652_s18 }
   0xb   :  { %p659_p6 = por %p658_p5, %p657_p4 }
   0xd   :  { %p660_p7 = pnand %p659_p6, %p653_p3 }
   0xf   :  { %663 = shalt.err (!%p660_p7)
}
  0x10   :  { %25 = dma.hbm_to_vmem [thread:$0]  %s932_s0, 128, %s23_s10, [#allocation3]  }
  0x11   :  { %686 = dma.done.wait [#allocation3], 128  }
  0x12   :  { %687 = vsyncadd [#allocation3], 4294967168  ;;  %v691_v0 = vmov 0.0|0.0   ;;  %vm692_vm0 = vmmov 0   ;;  %v693_v1 = vmov 0.0   ;;  %v46_v2 = vld [vmem:[%s933_s1] sm:$0xff] }
  0x13   :  { %573 = vmatprep.subr.bf16.mxu0 %v691_v0  ;;  %513 = vmatprep.mubr.msk.f32.mxu0 %vm692_vm0, %v693_v1  ;;  %v47_v3 = vld [vmem:[%s933_s1 + $0x8] sm:$0xff]  ;;  %v48_v4 = vld [vmem:[%s933_s1 + $0x10] sm:$0xff]  ;;  %v49_v6 = vld [vmem:[%s933_s1 + $0x18] sm:$0xff]  ;;  %vm155_vm1 = vcmask 523264  }
  0x14   :  { %597 = vmatprep.subr.bf16.mxu1 %v691_v0  ;;  %532 = vmatprep.mubr.msk.f32.mxu1 %vm692_vm0, %v693_v1  ;;  %v574_v5 = vpack.c.bf16 %v47_v3, %v46_v2  ;;  %v577_v7 = vpack.c.bf16 %v49_v6, %v48_v4  ;;  %v50_v8 = vld [vmem:[%s933_s1 + $0x20] sm:$0xff]  ;;  %v51_v9 = vld [vmem:[%s933_s1 + $0x28] sm:$0xff]  ;;  %v142_v12 = vld [vmem:[%s935_s3 + $0x10] sm:$0xff] }
  0x15   :  { %v140_v10 = vld [vmem:[%s935_s3] sm:$0xff]  ;;  %v141_v11 = vld [vmem:[%s935_s3 + $0x8] sm:$0xff]  ;;  %v143_v13 = vld [vmem:[%s935_s3 + $0x18] sm:$0xff]  ;;  %v580_v14 = vpack.c.bf16 %v51_v9, %v50_v8 }
  0x16   :  { %575 = vmatpush3.bf16.msra.mxu0 %v574_v5  ;;  %v598_v15 = vpack.c.bf16 %v141_v11, %v140_v10  ;;  %v52_v16 = vld [vmem:[%s933_s1 + $0x30] sm:$0xff]  ;;  %v53_v17 = vld [vmem:[%s933_s1 + $0x38] sm:$0xff]  ;;  %v601_v18 = vpack.c.bf16 %v143_v13, %v142_v12  ;;  %v144_v19 = vld [vmem:[%s935_s3 + $0x20] sm:$0xff] }
  0x17   :  { %576 = vmatprep.subr.bf16.mxu0 %v691_v0  ;;  %v145_v20 = vld [vmem:[%s935_s3 + $0x28] sm:$0xff]  ;;  %v583_v21 = vpack.c.bf16 %v53_v17, %v52_v16  ;;  %v54_v22 = vld [vmem:[%s933_s1 + $0x40] sm:$0xff]  ;;  %v56_v26 = vld [vmem:[%s933_s1 + $0x50] sm:$0xff] }
  0x18   :  { %599 = vmatpush3.bf16.msra.mxu1 %v598_v15  ;;  %v55_v23 = vld [vmem:[%s933_s1 + $0x48] sm:$0xff]  ;;  %v604_v24 = vpack.c.bf16 %v145_v20, %v144_v19  ;;  %v57_v27 = vld [vmem:[%s933_s1 + $0x58] sm:$0xff]  ;;  %v58_v29 = vld [vmem:[%s933_s1 + $0x60] sm:$0xff] }
  0x19   :  { %600 = vmatprep.subr.bf16.mxu1 %v691_v0  ;;  %v586_v25 = vpack.c.bf16 %v55_v23, %v54_v22  ;;  %v589_v28 = vpack.c.bf16 %v57_v27, %v56_v26  ;;  %v59_v30 = vld [vmem:[%s933_s1 + $0x68] sm:$0xff]  ;;  %v60_v32 = vld [vmem:[%s933_s1 + $0x70] sm:$0xff]  ;;  %v61_v33 = vld [vmem:[%s933_s1 + $0x78] sm:$0xff] }
  0x1a   :  { %578 = vmatpush3.bf16.msra.mxu0 %v577_v7  ;;  %v592_v31 = vpack.c.bf16 %v59_v30, %v58_v29  ;;  %v595_v34 = vpack.c.bf16 %v61_v33, %v60_v32  ;;  %v45_v35 = vld [vmem:[#allocation2] sm:$0xff]  ;;  %v146_v36 = vld [vmem:[%s935_s3 + $0x30] sm:$0xff]  ;;  %v147_v37 = vld [vmem:[%s935_s3 + $0x38] sm:$0xff] }
  0x1b   :  { %579 = vmatprep.subr.bf16.mxu0 %v691_v0  ;;  %v607_v38 = vpack.c.bf16 %v147_v37, %v146_v36  ;;  %v429_v39 = vld [vmem:[%s934_s2] ss:$0 sm:$0xff]  ;;  %v231_v41 = vld [vmem:[%s937_s5 + $0x8] sm:$0xff]  ;;  %v232_v47 = vld [vmem:[%s937_s5 + $0x10] sm:$0xff] }
  0x1c   :  { %602 = vmatpush3.bf16.msra.mxu1 %v601_v18  ;;  %v230_v40 = vld [vmem:[%s937_s5] sm:$0xff]  ;;  %v233_v48 = vld [vmem:[%s937_s5 + $0x18] sm:$0xff]  ;;  %v235_v51 = vld [vmem:[%s937_s5 + $0x28] sm:$0xff] }
  0x1d   :  { %603 = vmatprep.subr.bf16.mxu1 %v691_v0  ;;  %v610_v45 = vpack.c.bf16 %v231_v41, %v230_v40  ;;  %v613_v49 = vpack.c.bf16 %v233_v48, %v232_v47  ;;  %v234_v50 = vld [vmem:[%s937_s5 + $0x20] sm:$0xff]  ;;  %v236_v53 = vld [vmem:[%s937_s5 + $0x30] sm:$0xff]  ;;  %v237_v54 = vld [vmem:[%s937_s5 + $0x38] sm:$0xff] }
  0x1e   :  { %581 = vmatpush3.bf16.msra.mxu0 %v580_v14  ;;  %v616_v52 = vpack.c.bf16 %v235_v51, %v234_v50  ;;  %v619_v55 = vpack.c.bf16 %v237_v54, %v236_v53  ;;  %v319_v56 = vld [vmem:[%s939_s7] sm:$0xff]  ;;  %v320_v57 = vld [vmem:[%s939_s7 + $0x8] sm:$0xff]  ;;  %v321_v58 = vld [vmem:[%s939_s7 + $0x10] sm:$0xff] }
  0x1f   :  { %582 = vmatprep.subr.bf16.mxu0 %v691_v0  ;;  %v622_v59 = vpack.c.bf16 %v320_v57, %v319_v56  ;;  %v322_v60 = vld [vmem:[%s939_s7 + $0x18] sm:$0xff]  ;;  %v323_v62 = vld [vmem:[%s939_s7 + $0x20] sm:$0xff]  ;;  %v324_v63 = vld [vmem:[%s939_s7 + $0x28] sm:$0xff] }
  0x20   :  { %605 = vmatpush3.bf16.msra.mxu1 %v604_v24  ;;  %v625_v61 = vpack.c.bf16 %v322_v60, %v321_v58  ;;  %v430_v2 = vld [vmem:[%s936_s4] ss:$0 sm:$0xff]  ;;  %v325_v7 = vld [vmem:[%s939_s7 + $0x30] sm:$0xff]  ;;  %v326_v8 = vld [vmem:[%s939_s7 + $0x38] sm:$0xff]  ;;  %s694_s7 = smov [#allocation5]  }
  0x21   :  { %606 = vmatprep.subr.bf16.mxu1 %v691_v0  ;;  %v631_v9 = vpack.c.bf16 %v326_v8, %v325_v7  ;;  %v434_v14 = vld [vmem:[%s940_s8] ss:$0 sm:$0xff] }
  0x22   :  { %584 = vmatpush3.bf16.msra.mxu0 %v583_v21 }
  0x23   :  { %585 = vmatprep.subr.bf16.mxu0 %v691_v0 }
  0x24   :  { %608 = vmatpush3.bf16.msra.mxu1 %v607_v38 }
  0x25   :  { %609 = vmatprep.subr.bf16.mxu1 %v691_v0 }
  0x26   :  { %587 = vmatpush3.bf16.msra.mxu0 %v586_v25 }
  0x27   :  { %588 = vmatprep.subr.bf16.mxu0 %v691_v0 }
  0x2a   :  { %590 = vmatpush3.bf16.msra.mxu0 %v589_v28 }
  0x2b   :  { %591 = vmatprep.subr.bf16.mxu0 %v691_v0 }
  0x2e   :  { %593 = vmatpush3.bf16.msra.mxu0 %v592_v31 }
  0x2f   :  { %594 = vmatprep.subr.bf16.mxu0 %v691_v0 }
  0x32   :  { %596 = vmatpush3.bf16.msra.mxu0 %v595_v34 }
  0x33   :  { %621 = vmatprep.subr.bf16.mxu0 %v691_v0 }
  0x35   :  { %514 = vmatmul.mubr.f32.vlgmr.msra.gmra.mrb[0].mxu0 %v45_v35 }
  0x36   :  { %570 = vmatprep.mubr.msk.f32.mxu0 %vm692_vm0, %v693_v1  ;;  %623 = vmatpush3.bf16.msra.mxu0 %v622_v59 }
  0x37   :  { %624 = vmatprep.subr.bf16.mxu0 %v691_v0 }
  0x3a   :  { %626 = vmatpush3.bf16.msra.mxu0 %v625_v61 }
  0x3b   :  { %627 = vmatprep.subr.bf16.mxu0 %v691_v0 }
 0x108   :  { %v135_v42 = vpop.f32.mrb[0].mxu0 }
 0x109   :  { %v136_v43 = vadd.f32 %v429_v39, %v135_v42  ;;  %v515_v44 = vpop.f32.mrb[1].mxu0 }
 0x10b   :  { %v139_v46 = vmax.f32 %v136_v43, 0.0 }
 0x10d   :  { %533 = vmatmul.mubr.msk.f32.vlgmr.msra.gmra.mrb[0].mxu1 %vm155_vm1, %v139_v46 }
 0x10e   :  { %611 = vmatpush3.bf16.msra.mxu1 %v610_v45  ;;  %551 = vmatprep.mubr.msk.f32.mxu1 %vm692_vm0, %v693_v1  ;;  %v628_v1 = vpack.c.bf16 %v324_v63, %v323_v62 }
 0x10f   :  { %612 = vmatprep.subr.bf16.mxu1 %v691_v0 }
 0x110   :  { %629 = vmatpush3.bf16.msra.mxu0 %v628_v1 }
 0x111   :  { %630 = vmatprep.subr.bf16.mxu0 %v691_v0 }
 0x112   :  { %614 = vmatpush3.bf16.msra.mxu1 %v613_v49 }
 0x113   :  { %615 = vmatprep.subr.bf16.mxu1 %v691_v0 }
 0x114   :  { %632 = vmatpush3.bf16.msra.mxu0 %v631_v9 }
 0x116   :  { %617 = vmatpush3.bf16.msra.mxu1 %v616_v52 }
 0x117   :  { %618 = vmatprep.subr.bf16.mxu1 %v691_v0  ;;  %v432_v0 = vld [vmem:[%s938_s6] ss:$0 sm:$0xff]  ;;  %s420_s6 = sshll.u32 %s694_s7, 4  ;;  %s421_s6 = int_to_ptr.vmem [resolvable:$true] %s420_s6 }
 0x118   :  { %s664_s13 = scalar_lea.vmem %s421_s6, 128  ;;  %p669_p9 = scmp.lt.s32.totalorder %s421_s6, %s421_s6 }
 0x119   :  { %p665_p8 = scmp.ne.s32.totalorder %s421_s6, %s664_s13  ;;  %p670_p10 = scmp.lt.s32.totalorder %s664_s13, %s664_s13 }
 0x11a   :  { %620 = vmatpush3.bf16.msra.mxu1 %v619_v55 }
 0x11b   :  { %p671_p11 = por %p670_p10, %p669_p9 }
 0x11d   :  { %p672_p12 = pnand %p671_p11, %p665_p8 }
 0x1e0   :  { %v225_v3 = vpop.f32.mrb[0].mxu1 }
 0x1e1   :  { %v226_v4 = vadd.f32 %v430_v2, %v225_v3  ;;  %v534_v5 = vpop.f32.mrb[1].mxu1 }
 0x1e3   :  { %v229_v6 = vmax.f32 %v226_v4, 0.0 }
 0x1e5   :  { %552 = vmatmul.mubr.msk.f32.vlgmr.msra.gmra.mrb[2].mxu1 %vm155_vm1, %v229_v6 }
 0x2b8   :  { %v314_v10 = vpop.f32.mrb[2].mxu1 }
 0x2b9   :  { %v315_v11 = vadd.f32 %v432_v0, %v314_v10  ;;  %v553_v12 = vpop.f32.mrb[3].mxu1 }
 0x2bb   :  { %v318_v13 = vmax.f32 %v315_v11, 0.0 }
 0x2bd   :  { %571 = vmatmul.mubr.msk.f32.vlgmr.msra.gmra.mrb[2].mxu0 %vm155_vm1, %v318_v13 }
 0x390   :  { %v403_v15 = vpop.f32.mrb[2].mxu0 }
 0x391   :  { %v404_v16 = vadd.f32 %v434_v14, %v403_v15  ;;  %v572_v17 = vpop.f32.mrb[3].mxu0 }
 0x393   :  { %v436_v18 = vmul.f32 -1.442695, %v404_v16 }
 0x395   :  { %638 = vpow2.f32 %v436_v18 }
 0x39f   :  { %v639_v19 = vpop.eup %638 }
 0x3a0   :  { %v410_v20 = vadd.f32 1.0, %v639_v19 }
 0x3a2   :  { %640 = vrcp.f32 %v410_v20 }
 0x3ac   :  { %v641_v21 = vpop.eup %640 }
 0x3ad   :  { %413 = vst [vmem:[#allocation5] sm:$0xff] %v641_v21 }
 0x3ae   :  { %675 = shalt.err (!%p672_p12)
}
 0x3af   :  { %s676_s15 = scalar_lea.hbm %s941_s9, 128 }
 0x3b0   :  { %p677_p13 = scmp.ne.s32.totalorder %s941_s9, %s676_s15  ;;  %p680_p0 = scmp.lt.u32.totalorder %s676_s15, %s941_s9 }
 0x3b2   :  { %p682_p1 = pnand %p680_p0, %p677_p13 }
 0x3b4   :  { %685 = shalt.err (!%p682_p1)
}
 0x3b5   :  { %423 = dma.vmem_to_hbm [thread:$0]  %s421_s6, 128, %s941_s9, [#allocation4]  }
 0x3b6   :  { %688 = dma.done.wait [#allocation4], 128  }
 0x3b7   :  { %689 = vsyncadd [#allocation4], 4294967168 }
 0x3b8   :  { %427 = vsyncpa [#allocation3], 1 }
 0x3b9   :  { %428 = vsyncpa [#allocation4], 1 }

</bundles_post_ra>
